<compile_context>
chip_gen: v7x
topology: tpu7x:2x2x1
jax: 0.10.0
libtpu: 0.0.40
codegen_flags: <defaults>
</compile_context>

<pallas_src>
import functools

import jax
import jax.numpy as jnp
from jax import lax
from jax.experimental import pallas as pl
from jax.experimental.pallas import tpu as pltpu

_LANE = 128
_SUBLANE = 8


def _content_loss_kernel(x_ref, t_ref, o_ref, acc_sq, acc_ab, *,
                         total_rows, tile_rows, blocks_per_split, needs_mask):
    i = pl.program_id(1)

    @pl.when(i == 0)
    def _():
        acc_sq[...] = jnp.zeros_like(acc_sq)
        acc_ab[...] = jnp.zeros_like(acc_ab)

    # Cast in-kernel (VPU, hidden under DMA) so bf16 inputs move half the bytes.
    d = x_ref[...].astype(jnp.float32) - t_ref[...].astype(jnp.float32)

    if needs_mask:
        # Rows past the real array come from unspecified OOB block padding
        # (or from a clamped duplicate block) -> zero them out.
        c = pl.program_id(0)
        blk = c * blocks_per_split + i
        row = blk * tile_rows + lax.broadcasted_iota(jnp.int32, d.shape, 0)
        d = jnp.where(row < total_rows, d, jnp.float32(0.0))

    # Per-lane accumulation: pure VPU adds in the hot loop.
    acc_sq[...] += d * d
    acc_ab[...] += jnp.abs(d)

    @pl.when(i == pl.num_programs(1) - 1)
    def _():
        o_ref[0, 0] = jnp.sum(acc_sq[...])
        o_ref[0, 1] = jnp.sum(acc_ab[...])


def content_loss(x, target, eps=1e-8, tile_rows=1024, num_splits=2):
    """loss = sum((x - target)^2) / (sum(|x - target|) + eps), scalar f32."""
    assert x.shape == target.shape, "input and target must have the same shape"

    n = x.size
    # Pad only the tail (if any) up to one (8, 128) vreg tile; zero padding on
    # both operands contributes exactly 0 to both sums.
    granule = _SUBLANE * _LANE
    pad_n = pl.cdiv(n, granule) * granule
    flat_x = x.reshape(-1)
    flat_t = target.reshape(-1)
    if pad_n != n:
        flat_x = jnp.pad(flat_x, (0, pad_n - n))
        flat_t = jnp.pad(flat_t, (0, pad_n - n))
    rows = pad_n // _LANE                      # multiple of 8
    x2 = flat_x.reshape(rows, _LANE)
    t2 = flat_t.reshape(rows, _LANE)

    # Tile rows: large, multiple of the 8-row sublane granule, <= rows.
    tile_rows = max(_SUBLANE, (min(tile_rows, rows) // _SUBLANE) * _SUBLANE)
    num_blocks = pl.cdiv(rows, tile_rows)
    splits = max(1, min(num_splits, num_blocks))   # outer (megacore) axis
    bps = pl.cdiv(num_blocks, splits)              # blocks per split
    covered_rows = splits * bps * tile_rows
    needs_mask = covered_rows != rows
    needs_clamp = splits * bps > num_blocks

    if needs_clamp:
        # Never issue a fully out-of-bounds block DMA; duplicated (clamped)
        # blocks are fully masked in-kernel.
        def in_map(c, i):
            return (jnp.minimum(c * bps + i, num_blocks - 1), 0)
    else:
        def in_map(c, i):
            return (c * bps + i, 0)

    kernel = functools.partial(
        _content_loss_kernel,
        total_rows=rows,
        tile_rows=tile_rows,
        blocks_per_split=bps,
        needs_mask=needs_mask,
    )

    partials = pl.pallas_call(
        kernel,
        out_shape=jax.ShapeDtypeStruct((splits, 2), jnp.float32),
        grid_spec=pltpu.PrefetchScalarGridSpec(
            num_scalar_prefetch=0,
            grid=(splits, bps),
            in_specs=[
                pl.BlockSpec((tile_rows, _LANE), in_map),
                pl.BlockSpec((tile_rows, _LANE), in_map),
            ],
            out_specs=pl.BlockSpec((1, 2), lambda c, i: (c, 0),
                                   memory_space=pltpu.SMEM),
            scratch_shapes=[
                pltpu.VMEM((tile_rows, _LANE), jnp.float32),  # sum of squares
                pltpu.VMEM((tile_rows, _LANE), jnp.float32),  # sum of |diff|
            ],
        ),
        compiler_params=pltpu.CompilerParams(
            dimension_semantics=("parallel", "arbitrary"),
            vmem_limit_bytes=32 * 1024 * 1024,
        ),
    )(x2, t2)

    ssq = jnp.sum(partials[:, 0])
    sab = jnp.sum(partials[:, 1])
    return ssq / (sab + jnp.float32(eps))


if __name__ == "__main__":
    key = jax.random.PRNGKey(0)
    k1, k2, k3, k4, k5, k6 = jax.random.split(key, 6)

    # Case 1: NCHW conv feature map (batch=2, C=4, H=W=16), f32, defaults.
    x = jax.random.normal(k1, (2, 4, 16, 16), dtype=jnp.float32)
    target = jax.random.normal(k2, (2, 4, 16, 16), dtype=jnp.float32)
    loss = content_loss(x, target)
    jax.block_until_ready(loss)
    diff = x - target
    ref = jnp.sum(diff ** 2) / (jnp.sum(jnp.abs(diff)) + 1e-8)
    assert jnp.allclose(loss, ref, rtol=1e-5, atol=1e-6), (loss, ref)

    # Case 2: bf16 inputs + partial last tile + 2-way split with clamped
    # index_map (exercises the mask path and in-kernel cast).
    xb = jax.random.normal(k3, (3, 4, 16, 16), dtype=jnp.bfloat16)
    tb = jax.random.normal(k4, (3, 4, 16, 16), dtype=jnp.bfloat16)
    loss_b = content_loss(xb, tb, tile_rows=8)
    jax.block_until_ready(loss_b)
    db = xb.astype(jnp.float32) - tb.astype(jnp.float32)
    ref_b = jnp.sum(db ** 2) / (jnp.sum(jnp.abs(db)) + 1e-8)
    assert jnp.allclose(loss_b, ref_b, rtol=1e-4, atol=1e-5), (loss_b, ref_b)

    # Case 3: numel not a multiple of 1024 (exercises the tail zero-pad path).
    xs = jax.random.normal(k5, (2, 3, 5, 7), dtype=jnp.float32)
    ts = jax.random.normal(k6, (2, 3, 5, 7), dtype=jnp.float32)
    loss_s = content_loss(xs, ts)
    jax.block_until_ready(loss_s)
    ds = xs - ts
    ref_s = jnp.sum(ds ** 2) / (jnp.sum(jnp.abs(ds)) + 1e-8)
    assert jnp.allclose(loss_s, ref_s, rtol=1e-5, atol=1e-6), (loss_s, ref_s)

    print("KERNEL_OK")
</pallas_src>

<mosaic_0001>
module attributes {stable_mosaic.version = 11 : i64} {
  func.func @_content_loss_kernel(%arg0: i32, %arg1: i32, %arg2: memref<16x128xf32, #tpu.memory_space<vmem>>, %arg3: memref<16x128xf32, #tpu.memory_space<vmem>>, %arg4: memref<1x2xf32, #tpu.memory_space<smem>>, %arg5: memref<16x128xf32, #tpu.memory_space<vmem>>, %arg6: memref<16x128xf32, #tpu.memory_space<vmem>>) attributes {dimension_semantics = [#tpu.dimension_semantics<parallel>, #tpu.dimension_semantics<arbitrary>], iteration_bounds = array<i64: 1, 1>, scalar_prefetch = 0 : i64, scratch_operands = 2 : i64, tpu.core_type = #tpu.core_type<tc>, window_params = [{transform_indices = @transform_0, window_bounds = array<i64: 16, 128>}, {transform_indices = @transform_1, window_bounds = array<i64: 16, 128>}, {transform_indices = @transform_2, window_bounds = array<i64: 1, 2>}]} {
    %c0_i32 = arith.constant 0 : i32
    %0 = arith.cmpi eq, %arg1, %c0_i32 : i32
    %1 = arith.extui %0 : i1 to i32
    %c0_i32_0 = arith.constant 0 : i32
    %2 = arith.cmpi ne, %1, %c0_i32_0 : i32
    scf.if %2 {
      %cst = arith.constant 0.000000e+00 : f32
      %17 = vector.broadcast %cst : f32 to vector<16x128xf32>
      %c0_14 = arith.constant 0 : index
      %c0_15 = arith.constant 0 : index
      %18 = vector.load %arg5[%c0_14, %c0_15] : memref<16x128xf32, #tpu.memory_space<vmem>>, vector<16x128xf32>
      tpu.vector_store %arg5[%c0_14, %c0_15], %17 {strides = array<i32>} : memref<16x128xf32, #tpu.memory_space<vmem>>, vector<16x128xf32>,
      %cst_16 = arith.constant 0.000000e+00 : f32
      %19 = vector.broadcast %cst_16 : f32 to vector<16x128xf32>
      %c0_17 = arith.constant 0 : index
      %c0_18 = arith.constant 0 : index
      %20 = vector.load %arg6[%c0_17, %c0_18] : memref<16x128xf32, #tpu.memory_space<vmem>>, vector<16x128xf32>
      tpu.vector_store %arg6[%c0_17, %c0_18], %19 {strides = array<i32>} : memref<16x128xf32, #tpu.memory_space<vmem>>, vector<16x128xf32>,
    } else {
    }
    %c0 = arith.constant 0 : index
    %c0_1 = arith.constant 0 : index
    %3 = vector.load %arg2[%c0, %c0_1] : memref<16x128xf32, #tpu.memory_space<vmem>>, vector<16x128xf32>
    %c0_2 = arith.constant 0 : index
    %c0_3 = arith.constant 0 : index
    %4 = vector.load %arg3[%c0_2, %c0_3] : memref<16x128xf32, #tpu.memory_space<vmem>>, vector<16x128xf32>
    %5 = arith.subf %3, %4 : vector<16x128xf32>
    %c0_4 = arith.constant 0 : index
    %c0_5 = arith.constant 0 : index
    %6 = vector.load %arg5[%c0_4, %c0_5] : memref<16x128xf32, #tpu.memory_space<vmem>>, vector<16x128xf32>
    %7 = arith.mulf %5, %5 : vector<16x128xf32>
    %8 = arith.addf %6, %7 : vector<16x128xf32>
    %c0_6 = arith.constant 0 : index
    %c0_7 = arith.constant 0 : index
    %9 = vector.load %arg5[%c0_6, %c0_7] : memref<16x128xf32, #tpu.memory_space<vmem>>, vector<16x128xf32>
    tpu.vector_store %arg5[%c0_6, %c0_7], %8 {strides = array<i32>} : memref<16x128xf32, #tpu.memory_space<vmem>>, vector<16x128xf32>,
    %c0_8 = arith.constant 0 : index
    %c0_9 = arith.constant 0 : index
    %10 = vector.load %arg6[%c0_8, %c0_9] : memref<16x128xf32, #tpu.memory_space<vmem>>, vector<16x128xf32>
    %11 = math.absf %5 : vector<16x128xf32>
    %12 = arith.addf %10, %11 : vector<16x128xf32>
    %c0_10 = arith.constant 0 : index
    %c0_11 = arith.constant 0 : index
    %13 = vector.load %arg6[%c0_10, %c0_11] : memref<16x128xf32, #tpu.memory_space<vmem>>, vector<16x128xf32>
    tpu.vector_store %arg6[%c0_10, %c0_11], %12 {strides = array<i32>} : memref<16x128xf32, #tpu.memory_space<vmem>>, vector<16x128xf32>,
    %c0_i32_12 = arith.constant 0 : i32
    %14 = arith.cmpi eq, %arg1, %c0_i32_12 : i32
    %15 = arith.extui %14 : i1 to i32
    %c0_i32_13 = arith.constant 0 : i32
    %16 = arith.cmpi ne, %15, %c0_i32_13 : i32
    scf.if %16 {
      %c0_14 = arith.constant 0 : index
      %c0_15 = arith.constant 0 : index
      %17 = vector.load %arg5[%c0_14, %c0_15] : memref<16x128xf32, #tpu.memory_space<vmem>>, vector<16x128xf32>
      %18 = vector.shape_cast %17 : vector<16x128xf32> to vector<1x16x128xf32>
      %cst = arith.constant dense<0.000000e+00> : vector<1xf32>
      %19 = vector.multi_reduction <add>, %18, %cst [1, 2] : vector<1x16x128xf32> to vector<1xf32>
      %20 = vector.shape_cast %19 : vector<1xf32> to vector<1x1x1xf32>
      %21 = vector.extract %20[0, 0, 0] : f32 from vector<1x1x1xf32>
      %c0_16 = arith.constant 0 : index
      %c0_17 = arith.constant 0 : index
      %22 = memref.load %arg4[%c0_16, %c0_17] : memref<1x2xf32, #tpu.memory_space<smem>>
      memref.store %21, %arg4[%c0_16, %c0_17] : memref<1x2xf32, #tpu.memory_space<smem>>
      %c0_18 = arith.constant 0 : index
      %c0_19 = arith.constant 0 : index
      %23 = vector.load %arg6[%c0_18, %c0_19] : memref<16x128xf32, #tpu.memory_space<vmem>>, vector<16x128xf32>
      %24 = vector.shape_cast %23 : vector<16x128xf32> to vector<1x16x128xf32>
      %cst_20 = arith.constant dense<0.000000e+00> : vector<1xf32>
      %25 = vector.multi_reduction <add>, %24, %cst_20 [1, 2] : vector<1x16x128xf32> to vector<1xf32>
      %26 = vector.shape_cast %25 : vector<1xf32> to vector<1x1x1xf32>
      %27 = vector.extract %26[0, 0, 0] : f32 from vector<1x1x1xf32>
      %c0_21 = arith.constant 0 : index
      %c1 = arith.constant 1 : index
      %28 = memref.load %arg4[%c0_21, %c1] : memref<1x2xf32, #tpu.memory_space<smem>>
      memref.store %27, %arg4[%c0_21, %c1] : memref<1x2xf32, #tpu.memory_space<smem>>
    } else {
    }
    return
  }
  func.func @transform_0(%arg0: i32, %arg1: i32) -> (i32, i32) {
    %c1_i32 = arith.constant 1 : i32
    %0 = arith.muli %arg0, %c1_i32 : i32
    %1 = arith.addi %0, %arg1 : i32
    %c0_i32 = arith.constant 0 : i32
    %c0_i32_0 = arith.constant 0 : i32
    return %1, %c0_i32 : i32, i32
  }
  func.func @transform_1(%arg0: i32, %arg1: i32) -> (i32, i32) {
    %c1_i32 = arith.constant 1 : i32
    %0 = arith.muli %arg0, %c1_i32 : i32
    %1 = arith.addi %0, %arg1 : i32
    %c0_i32 = arith.constant 0 : i32
    %c0_i32_0 = arith.constant 0 : i32
    return %1, %c0_i32 : i32, i32
  }
  func.func @transform_2(%arg0: i32, %arg1: i32) -> (i32, i32) {
    %c0_i32 = arith.constant 0 : i32
    %c0_i32_0 = arith.constant 0 : i32
    return %arg0, %c0_i32 : i32, i32
  }
}

</mosaic_0001>

<bundles_post_ra>
// kernel: tpu_custom_call.1
= control target key start
LH: loop header
LB: loop body
LE: loop exit
PB: predicated region body
PF: predicated region fallthrough
CT: control target
= control target key end

     0   :  { %7 = vsyncpa [#allocation5], 0  ;;  %s253_s0 = inlined_call_operand.hbm [shape: f32[16,128], index: 0, kind: input, shape index: {}]   ;;  %s254_s1 = inlined_call_operand.hbm [shape: f32[16,128], index: 1, kind: input, shape index: {}]   ;;  %s255_s2 = inlined_call_operand.hbm [shape: f32[1,2], index: 2, kind: output, shape index: {}]  }
   0x1   :  { %8 = vsyncpa [#allocation8], 0 }
   0x2   :  { %9 = vsyncpa [#allocation6], 0  ;;  %s197_s9 = smov [#allocation4]   ;;  %s137_s13 = scalar_lea.hbm %s253_s0, 256 }
   0x3   :  { %s19_s10 = sshll.u32 %s197_s9, 4  ;;  %p138_p0 = scmp.ne.s32.totalorder %s253_s0, %s137_s13  ;;  %s20_s10 = int_to_ptr.vmem [resolvable:$true] %s19_s10 }
   0x4   :  { %p141_p1 = scmp.lt.u32.totalorder %s137_s13, %s253_s0 }
   0x6   :  { %p143_p2 = pnand %p141_p1, %p138_p0 }
   0x8   :  { %146 = shalt.err (!%p143_p2)
}
   0x9   :  { %s147_s18 = scalar_lea.vmem %s20_s10, 256  ;;  %p152_p4 = scmp.lt.s32.totalorder %s20_s10, %s20_s10 }
   0xa   :  { %p148_p3 = scmp.ne.s32.totalorder %s20_s10, %s147_s18  ;;  %p153_p5 = scmp.lt.s32.totalorder %s147_s18, %s147_s18 }
   0xc   :  { %p154_p6 = por %p153_p5, %p152_p4 }
   0xe   :  { %p155_p7 = pnand %p154_p6, %p148_p3 }
  0x10   :  { %158 = shalt.err (!%p155_p7)
}
  0x11   :  { %s198_s19 = smov 128   ;;  %s199_s20 = smov 8  }
  0x12   :  { %25 = dma.hbm_to_vmem [thread:$0]  %s253_s0, 256, %s20_s10, [#allocation5], %s198_s19, %s198_s19, %s199_s20  }
  0x13   :  { %s200_s23 = smov [#allocation7]   ;;  %s159_s27 = scalar_lea.hbm %s254_s1, 256 }
  0x14   :  { %s35_s24 = sshll.u32 %s200_s23, 4  ;;  %p160_p8 = scmp.ne.s32.totalorder %s254_s1, %s159_s27  ;;  %s36_s24 = int_to_ptr.vmem [resolvable:$true] %s35_s24 }
  0x15   :  { %p163_p9 = scmp.lt.u32.totalorder %s159_s27, %s254_s1 }
  0x17   :  { %p165_p10 = pnand %p163_p9, %p160_p8 }
  0x19   :  { %168 = shalt.err (!%p165_p10)
}
  0x1a   :  { %s169_s4 = scalar_lea.vmem %s36_s24, 256  ;;  %p174_p12 = scmp.lt.s32.totalorder %s36_s24, %s36_s24 }
  0x1b   :  { %p170_p11 = scmp.ne.s32.totalorder %s36_s24, %s169_s4  ;;  %p175_p13 = scmp.lt.s32.totalorder %s169_s4, %s169_s4 }
  0x1d   :  { %p176_p0 = por %p175_p13, %p174_p12 }
  0x1f   :  { %p177_p1 = pnand %p176_p0, %p170_p11 }
  0x21   :  { %180 = shalt.err (!%p177_p1)
}
  0x22   :  { %41 = dma.hbm_to_vmem [thread:$0]  %s254_s1, 256, %s36_s24, [#allocation8], %s198_s19, %s198_s19, %s199_s20  }
  0x23   :  { %191 = dma.done.wait [#allocation5], 256  }
  0x24   :  { %192 = vsyncadd [#allocation5], 4294967040 }
  0x25   :  { %193 = dma.done.wait [#allocation8], 256  }
  0x26   :  { %194 = vsyncadd [#allocation8], 4294967040  ;;  %v60_v0 = vld [vmem:[#allocation4] sm:$0xff]  ;;  %v61_v1 = vld [vmem:[#allocation4 + $0x8] sm:$0xff]  ;;  %s181_s9 = scalar_lea.hbm %s255_s2, 16 }
  0x27   :  { %v62_v2 = vld [vmem:[#allocation7] sm:$0xff]  ;;  %v63_v3 = vld [vmem:[#allocation7 + $0x8] sm:$0xff]  ;;  %p182_p2 = scmp.ne.s32.totalorder %s255_s2, %s181_s9  ;;  %p185_p3 = scmp.lt.u32.totalorder %s181_s9, %s255_s2 }
  0x28   :  { %v64_v4 = vsub.f32 %v60_v0, %v62_v2  ;;  %v65_v5 = vsub.f32 %v61_v1, %v63_v3 }
  0x29   :  { %p187_p4 = pnand %p185_p3, %p182_p2 }
  0x2a   :  { %v68_v6 = vmul.f32 %v64_v4, %v64_v4  ;;  %v69_v7 = vmul.f32 %v65_v5, %v65_v5  ;;  %v76_v8 = vand.u32 2147483647, %v64_v4  ;;  %v77_v9 = vand.u32 2147483647, %v65_v5 }
  0x2c   :  { %v87_v10 = vadd.f32 %v69_v7, %v68_v6  ;;  %v101_v11 = vadd.f32 %v77_v9, %v76_v8 }
  0x2e   :  { %88 = vadd.xlane.f32.xlu0 %v87_v10 }
  0x32   :  { %102 = vadd.xlane.f32.xlu0 %v101_v11 }
  0xbb   :  { %v89_v12 = vpop.xlane.xlu0 %88 }
  0xbc   :  { %v90_v13 = vrot.slane %v89_v12, 4 }
  0xbe   :  { %v91_v14 = vadd.f32 %v90_v13, %v89_v12 }
  0xbf   :  { %v103_v15 = vpop.xlane.xlu0 %102 }
  0xc0   :  { %v92_v16 = vrot.slane %v91_v14, 2  ;;  %v104_v17 = vrot.slane %v103_v15, 4 }
  0xc2   :  { %v105_v18 = vadd.f32 %v104_v17, %v103_v15  ;;  %v93_v19 = vadd.f32 %v92_v16, %v91_v14 }
  0xc4   :  { %v106_v20 = vrot.slane %v105_v18, 2  ;;  %v94_v21 = vrot.slane %v93_v19, 1 }
  0xc6   :  { %v107_v22 = vadd.f32 %v106_v20, %v105_v18  ;;  %v95_v23 = vadd.f32 %v94_v21, %v93_v19 }
  0xc8   :  { %128 = vpush %v95_v23  ;;  %v108_v24 = vrot.slane %v107_v22, 1 }
  0xca   :  { %v109_v25 = vadd.f32 %v108_v24, %v107_v22 }
  0xcc   :  { %130 = vpush %v109_v25 }
  0xf9   :  { %s129_s1 = spop %128 }
  0xfa   :  { %98 = sst [smem:[#allocation9]] %s129_s1 }
  0xfd   :  { %s131_s6 = spop %130 }
  0xfe   :  { %112 = sst [smem:[#allocation9 + $0x1]] %s131_s6 }
  0xff   :  { %190 = shalt.err (!%p187_p4)
}
 0x100   :  { %s201_s14 = smov [#allocation9]  }
 0x101   :  { %120 = dma.smem_to_hbm %s201_s14, 16, %s255_s2, [#allocation6]  }
 0x102   :  { %195 = dma.done.wait [#allocation6], 16  }
 0x103   :  { %196 = vsyncadd [#allocation6], 4294967280 }
 0x104   :  { %124 = sfence }
 0x105   :  { %125 = vsyncpa [#allocation5], 1 }
 0x106   :  { %126 = vsyncpa [#allocation8], 1 }
 0x107   :  { %127 = vsyncpa [#allocation6], 1 }

</bundles_post_ra>
